<compile_context>
chip_gen: v7x
topology: tpu7x:2x2x1
jax: 0.10.0
libtpu: 0.0.40
codegen_flags: <defaults>
</compile_context>

<pallas_src>
import functools

import jax
import jax.numpy as jnp
from jax import lax
from jax.experimental import pallas as pl
from jax.experimental.pallas import tpu as pltpu


def _siglip2_attn_kernel(x_ref, wqkv_ref, bqkv_ref, wout_ref, bout_ref, o_ref,
                         q_scr, k_scr, v_scr, ctx_ref,
                         *, num_heads, head_dim, q_tile):
    """Grid = (batch, q_tiles). One step produces one (q_tile, H) output slab.

    x_ref    : (1, S, H)   bf16  full sequence for this batch element
    wqkv_ref : (H, 3H)     bf16  (softmax scale pre-folded into the Q columns)
    bqkv_ref : (1, 3H)     f32   (softmax scale pre-folded into the Q part)
    wout_ref : (H, H)      bf16
    bout_ref : (1, H)      f32
    o_ref    : (1, tq, H)  f32
    q_scr    : (nh, S, d)  bf16  head-major Q, persists across q-tiles
    k_scr    : (nh, S, d)  bf16  head-major K, persists across q-tiles
    v_scr    : (nh, S, d)  bf16  head-major V, persists across q-tiles
    ctx_ref  : (tq, H)     bf16  merged-head context for this q-tile
    """
    H = num_heads * head_dim
    qi = pl.program_id(1)

    # --- QKV projection + head-major relayout, once per batch element -------
    @pl.when(qi == 0)
    def _():
        qkv = jnp.dot(x_ref[0], wqkv_ref[...],
                      preferred_element_type=jnp.float32) + bqkv_ref[...]
        qkv = qkv.astype(jnp.bfloat16)                               # (S, 3H)
        # Non-128-aligned lane slices are paid once per batch element here,
        # instead of once per head per q-tile in the attention loop.
        for h in range(num_heads):
            c = h * head_dim
            q_scr[h] = qkv[:, c:c + head_dim]
            k_scr[h] = qkv[:, H + c:H + c + head_dim]
            v_scr[h] = qkv[:, 2 * H + c:2 * H + c + head_dim]
        # TODO(synk): for v7x (64 MiB VMEM) / large-S NaFlex configs, drop Q
        # from the persistent scratch (compute it per q-tile) and stream K/V
        # tiles with an online softmax instead of holding (S, 3H) resident;
        # that also lets the q axis be marked "parallel" for megacore.

    # --- attention for this q-tile, all heads --------------------------------
    row0 = pl.multiple_of(qi * q_tile, q_tile)
    for h in range(num_heads):                       # static unroll over heads
        c = h * head_dim
        q = q_scr[h, pl.ds(row0, q_tile), :]                         # (tq, d) bf16
        k = k_scr[h]                                                 # (S, d)  bf16
        v = v_scr[h]                                                 # (S, d)  bf16

        # s = q @ k.T without materializing k.T (contract on last dims).
        # TODO(synk): if the bundle dump shows a per-head vxpose of k here,
        # store K pre-transposed as (nh, d, S) at projection time instead.
        s = lax.dot_general(q, k, (((1,), (1,)), ((), ())),
                            preferred_element_type=jnp.float32)      # (tq, S) f32
        s = s - jnp.max(s, axis=-1, keepdims=True)
        p = jnp.exp(s)
        p = p * pl.reciprocal(jnp.sum(p, axis=-1, keepdims=True), approx=True)

        ho = jnp.dot(p.astype(jnp.bfloat16), v,
                     preferred_element_type=jnp.float32)             # (tq, d) f32
        # Merge heads into a lane-dense (tq, H) context; the out-projection is
        # then ONE K=H GEMM per tile instead of num_heads K=head_dim GEMMs.
        ctx_ref[:, c:c + head_dim] = ho.astype(jnp.bfloat16)

    # --- fused output projection (bias folded in, no extra f32 passes) -------
    o_ref[0] = (jnp.dot(ctx_ref[...], wout_ref[...],
                        preferred_element_type=jnp.float32)
                + bout_ref[...]).astype(o_ref.dtype)


def _pick_q_tile(seq_len):
    # Largest of (512, 256, 128) dividing seq_len, capped so the per-head
    # (tq, S) f32 score/prob temporaries stay within a modest VMEM budget.
    score_budget = 4 * 1024 * 1024                 # bytes for one (tq, S) f32 tile
    candidates = [t for t in (512, 256, 128) if seq_len % t == 0]
    for t in candidates:
        if t * seq_len * 4 <= score_budget:
            return t
    if candidates:
        return candidates[-1]
    # TODO(synk): pad odd (NaFlex-style) sequence lengths instead of falling
    # back to a full-length tile (which materializes (S, S) f32 scores).
    return seq_len


def _vmem_limit_bytes():
    # Generation-aware limit with ~25% headroom for Mosaic internal scratch
    # and the f32 score temporaries (v7x has only 64 MiB per TensorCore;
    # v5e/v6e can go toward ~96 MiB).
    try:
        cap = pltpu.get_tpu_info().vmem_capacity_bytes
    except Exception:
        cap = 128 * 1024 * 1024
    return int(cap * 3 // 4)


def siglip2_attention(hidden_states, w_qkv, b_qkv, w_out, b_out, *, num_heads):
    """hidden_states: (B, S, H); w_qkv: (H, 3H); b_qkv: (3H,);
    w_out: (H, H); b_out: (H,).  Weights are (in_features, out_features)."""
    B, S, H = hidden_states.shape
    head_dim = H // num_heads
    scale = head_dim ** -0.5
    q_tile = _pick_q_tile(S)
    n_q = S // q_tile

    # Fold the softmax scale into the Q columns of the QKV projection (scale
    # only affects Q), so the kernel never re-scales q.
    qkv_scale = jnp.concatenate([jnp.full((H,), scale, jnp.float32),
                                 jnp.ones((2 * H,), jnp.float32)])
    w_qkv_bf = (w_qkv.astype(jnp.float32) * qkv_scale).astype(jnp.bfloat16)
    b_qkv2 = (b_qkv.astype(jnp.float32) * qkv_scale).reshape(1, 3 * H)
    w_out_bf = w_out.astype(jnp.bfloat16)
    b_out2 = b_out.reshape(1, H).astype(jnp.float32)
    # bf16 activations: halves x's HBM DMA / VMEM block; matmuls accumulate f32.
    x_bf = hidden_states.astype(jnp.bfloat16)

    kernel = functools.partial(_siglip2_attn_kernel,
                               num_heads=num_heads, head_dim=head_dim,
                               q_tile=q_tile)

    # Constant-index weights/biases: single-buffered (pipelining buys nothing).
    def wspec(shape):
        return pl.BlockSpec(shape, lambda b, q: (0, 0),
                            pipeline_mode=pl.Buffered(1))

    return pl.pallas_call(
        kernel,
        out_shape=jax.ShapeDtypeStruct((B, S, H), jnp.float32),
        grid_spec=pltpu.PrefetchScalarGridSpec(
            num_scalar_prefetch=0,
            grid=(B, n_q),
            in_specs=[
                pl.BlockSpec((1, S, H), lambda b, q: (b, 0, 0)),     # x (bf16)
                wspec((H, 3 * H)),                                   # w_qkv (bf16)
                wspec((1, 3 * H)),                                   # b_qkv (f32)
                wspec((H, H)),                                       # w_out (bf16)
                wspec((1, H)),                                       # b_out (f32)
            ],
            out_specs=pl.BlockSpec((1, q_tile, H), lambda b, q: (b, q, 0)),
            scratch_shapes=[
                pltpu.VMEM((num_heads, S, head_dim), jnp.bfloat16),  # Q head-major
                pltpu.VMEM((num_heads, S, head_dim), jnp.bfloat16),  # K head-major
                pltpu.VMEM((num_heads, S, head_dim), jnp.bfloat16),  # V head-major
                pltpu.VMEM((q_tile, H), jnp.bfloat16),               # merged context
            ],
        ),
        compiler_params=pltpu.CompilerParams(
            dimension_semantics=("parallel", "arbitrary"),
            vmem_limit_bytes=_vmem_limit_bytes()),
    )(x_bf, w_qkv_bf, b_qkv2, w_out_bf, b_out2)


def _reference(hidden_states, w_qkv, b_qkv, w_out, b_out, *, num_heads):
    B, S, H = hidden_states.shape
    d = H // num_heads
    scale = d ** -0.5
    qkv = hidden_states @ w_qkv + b_qkv                              # (B, S, 3H)
    q, k, v = jnp.split(qkv, 3, axis=-1)
    q = q.reshape(B, S, num_heads, d).transpose(0, 2, 1, 3)
    k = k.reshape(B, S, num_heads, d).transpose(0, 2, 1, 3)
    v = v.reshape(B, S, num_heads, d).transpose(0, 2, 1, 3)
    s = jnp.einsum('bhqd,bhkd->bhqk', q, k) * scale
    p = jax.nn.softmax(s, axis=-1)
    o = jnp.einsum('bhqk,bhkd->bhqd', p, v)
    o = o.transpose(0, 2, 1, 3).reshape(B, S, H)
    return o @ w_out + b_out


if __name__ == "__main__":
    # Config: hidden_size=32, num_attention_heads=4, attention_dropout=0.0
    B, S, H = 2, 8, 32
    NUM_HEADS = 4

    key = jax.random.PRNGKey(0)
    kx, k1, k2, k3, k4 = jax.random.split(key, 5)

    hidden_states = jax.random.normal(kx, (B, S, H), dtype=jnp.float32)
    # PyTorch nn.Linear stores (out_features, in_features); we store the
    # transpose (in_features, out_features) so the kernel does x @ W + b.
    w_qkv = jax.random.normal(k1, (H, 3 * H), dtype=jnp.float32) * 0.05
    b_qkv = jax.random.normal(k2, (3 * H,), dtype=jnp.float32) * 0.05
    w_out = jax.random.normal(k3, (H, H), dtype=jnp.float32) * 0.05
    b_out = jax.random.normal(k4, (H,), dtype=jnp.float32) * 0.05

    out = siglip2_attention(hidden_states, w_qkv, b_qkv, w_out, b_out,
                            num_heads=NUM_HEADS)
    out = jax.block_until_ready(out)

    ref = _reference(hidden_states, w_qkv, b_qkv, w_out, b_out,
                     num_heads=NUM_HEADS)
    assert out.shape == (B, S, H)
    err = float(jnp.max(jnp.abs(out - ref)))
    # bf16 MXU matmuls + approx softmax reciprocal => looser tolerance than f32.
    assert jnp.allclose(out, ref, atol=2e-2, rtol=2e-2), (
        f"mismatch vs reference (max |err|={err})")

    print("KERNEL_OK")
</pallas_src>

<mosaic_0001>
module attributes {stable_mosaic.version = 11 : i64} {
  func.func @_siglip2_attn_kernel(%arg0: i32, %arg1: i32, %arg2: memref<1x8x32xbf16, #tpu.memory_space<vmem>>, %arg3: memref<32x96xbf16, #tpu.memory_space<vmem>>, %arg4: memref<1x96xf32, #tpu.memory_space<vmem>>, %arg5: memref<32x32xbf16, #tpu.memory_space<vmem>>, %arg6: memref<1x32xf32, #tpu.memory_space<vmem>>, %arg7: memref<1x8x32xf32, #tpu.memory_space<vmem>>, %arg8: memref<4x8x8xbf16, #tpu.memory_space<vmem>>, %arg9: memref<4x8x8xbf16, #tpu.memory_space<vmem>>, %arg10: memref<4x8x8xbf16, #tpu.memory_space<vmem>>, %arg11: memref<8x32xbf16, #tpu.memory_space<vmem>>) attributes {dimension_semantics = [#tpu.dimension_semantics<parallel>, #tpu.dimension_semantics<arbitrary>], iteration_bounds = array<i64: 2, 1>, scalar_prefetch = 0 : i64, scratch_operands = 4 : i64, tpu.core_type = #tpu.core_type<tc>, window_params = [{transform_indices = @transform_0, window_bounds = array<i64: 1, 8, 32>}, {pipeline_mode = #tpu.pipeline_mode<synchronous>, transform_indices = @transform_1, window_bounds = array<i64: 32, 96>}, {pipeline_mode = #tpu.pipeline_mode<synchronous>, transform_indices = @transform_2, window_bounds = array<i64: 1, 96>}, {pipeline_mode = #tpu.pipeline_mode<synchronous>, transform_indices = @transform_3, window_bounds = array<i64: 32, 32>}, {pipeline_mode = #tpu.pipeline_mode<synchronous>, transform_indices = @transform_4, window_bounds = array<i64: 1, 32>}, {transform_indices = @transform_5, window_bounds = array<i64: 1, 8, 32>}]} {
    %c0_i32 = arith.constant 0 : i32
    %0 = arith.cmpi eq, %arg1, %c0_i32 : i32
    %1 = arith.extui %0 : i1 to i32
    %c0_i32_0 = arith.constant 0 : i32
    %2 = arith.cmpi ne, %1, %c0_i32_0 : i32
    scf.if %2 {
      %c0_59 = arith.constant 0 : index
      %c0_60 = arith.constant 0 : index
      %c0_61 = arith.constant 0 : index
      %102 = vector.load %arg2[%c0_59, %c0_60, %c0_61] : memref<1x8x32xbf16, #tpu.memory_space<vmem>>, vector<1x8x32xbf16>
      %103 = vector.shape_cast %102 : vector<1x8x32xbf16> to vector<8x32xbf16>
      %c0_62 = arith.constant 0 : index
      %c0_63 = arith.constant 0 : index
      %104 = vector.load %arg3[%c0_62, %c0_63] : memref<32x96xbf16, #tpu.memory_space<vmem>>, vector<32x96xbf16>
      %cst_64 = arith.constant dense<0.000000e+00> : vector<8x96xf32>
      %105 = tpu.matmul %103, %104, %cst_64 {dimension_numbers = #tpu.dot_dimension_numbers<[1], [0], [0], [1], [0, 0, 1, 1], [], []>} : vector<8x32xbf16>, vector<32x96xbf16>, vector<8x96xf32> -> vector<8x96xf32>
      %c0_65 = arith.constant 0 : index
      %c0_66 = arith.constant 0 : index
      %106 = vector.load %arg4[%c0_65, %c0_66] : memref<1x96xf32, #tpu.memory_space<vmem>>, vector<1x96xf32>
      %107 = vector.broadcast %106 : vector<1x96xf32> to vector<8x96xf32>
      %108 = arith.addf %105, %107 : vector<8x96xf32>
      %109 = arith.truncf %108 : vector<8x96xf32> to vector<8x96xbf16>
      %110 = vector.extract_strided_slice %109 {offsets = [0, 0], sizes = [8, 8], strides = [1, 1]} : vector<8x96xbf16> to vector<8x8xbf16>
      %c0_67 = arith.constant 0 : index
      %c0_68 = arith.constant 0 : index
      %c0_69 = arith.constant 0 : index
      %111 = vector.load %arg8[%c0_67, %c0_68, %c0_69] : memref<4x8x8xbf16, #tpu.memory_space<vmem>>, vector<1x8x8xbf16>
      %112 = vector.shape_cast %111 : vector<1x8x8xbf16> to vector<8x8xbf16>
      %113 = vector.shape_cast %110 : vector<8x8xbf16> to vector<1x8x8xbf16>
      tpu.vector_store %arg8[%c0_67, %c0_68, %c0_69], %113 {strides = array<i32>} : memref<4x8x8xbf16, #tpu.memory_space<vmem>>, vector<1x8x8xbf16>,
      %114 = vector.extract_strided_slice %109 {offsets = [0, 32], sizes = [8, 8], strides = [1, 1]} : vector<8x96xbf16> to vector<8x8xbf16>
      %c0_70 = arith.constant 0 : index
      %c0_71 = arith.constant 0 : index
      %c0_72 = arith.constant 0 : index
      %115 = vector.load %arg9[%c0_70, %c0_71, %c0_72] : memref<4x8x8xbf16, #tpu.memory_space<vmem>>, vector<1x8x8xbf16>
      %116 = vector.shape_cast %115 : vector<1x8x8xbf16> to vector<8x8xbf16>
      %117 = vector.shape_cast %114 : vector<8x8xbf16> to vector<1x8x8xbf16>
      tpu.vector_store %arg9[%c0_70, %c0_71, %c0_72], %117 {strides = array<i32>} : memref<4x8x8xbf16, #tpu.memory_space<vmem>>, vector<1x8x8xbf16>,
      %118 = vector.extract_strided_slice %109 {offsets = [0, 64], sizes = [8, 8], strides = [1, 1]} : vector<8x96xbf16> to vector<8x8xbf16>
      %c0_73 = arith.constant 0 : index
      %c0_74 = arith.constant 0 : index
      %c0_75 = arith.constant 0 : index
      %119 = vector.load %arg10[%c0_73, %c0_74, %c0_75] : memref<4x8x8xbf16, #tpu.memory_space<vmem>>, vector<1x8x8xbf16>
      %120 = vector.shape_cast %119 : vector<1x8x8xbf16> to vector<8x8xbf16>
      %121 = vector.shape_cast %118 : vector<8x8xbf16> to vector<1x8x8xbf16>
      tpu.vector_store %arg10[%c0_73, %c0_74, %c0_75], %121 {strides = array<i32>} : memref<4x8x8xbf16, #tpu.memory_space<vmem>>, vector<1x8x8xbf16>,
      %122 = vector.extract_strided_slice %109 {offsets = [0, 8], sizes = [8, 8], strides = [1, 1]} : vector<8x96xbf16> to vector<8x8xbf16>
      %c1_76 = arith.constant 1 : index
      %c0_77 = arith.constant 0 : index
      %c0_78 = arith.constant 0 : index
      %123 = vector.load %arg8[%c1_76, %c0_77, %c0_78] : memref<4x8x8xbf16, #tpu.memory_space<vmem>>, vector<1x8x8xbf16>
      %124 = vector.shape_cast %123 : vector<1x8x8xbf16> to vector<8x8xbf16>
      %125 = vector.shape_cast %122 : vector<8x8xbf16> to vector<1x8x8xbf16>
      tpu.vector_store %arg8[%c1_76, %c0_77, %c0_78], %125 {strides = array<i32>} : memref<4x8x8xbf16, #tpu.memory_space<vmem>>, vector<1x8x8xbf16>,
      %126 = vector.extract_strided_slice %109 {offsets = [0, 40], sizes = [8, 8], strides = [1, 1]} : vector<8x96xbf16> to vector<8x8xbf16>
      %c1_79 = arith.constant 1 : index
      %c0_80 = arith.constant 0 : index
      %c0_81 = arith.constant 0 : index
      %127 = vector.load %arg9[%c1_79, %c0_80, %c0_81] : memref<4x8x8xbf16, #tpu.memory_space<vmem>>, vector<1x8x8xbf16>
      %128 = vector.shape_cast %127 : vector<1x8x8xbf16> to vector<8x8xbf16>
      %129 = vector.shape_cast %126 : vector<8x8xbf16> to vector<1x8x8xbf16>
      tpu.vector_store %arg9[%c1_79, %c0_80, %c0_81], %129 {strides = array<i32>} : memref<4x8x8xbf16, #tpu.memory_space<vmem>>, vector<1x8x8xbf16>,
      %130 = vector.extract_strided_slice %109 {offsets = [0, 72], sizes = [8, 8], strides = [1, 1]} : vector<8x96xbf16> to vector<8x8xbf16>
      %c1_82 = arith.constant 1 : index
      %c0_83 = arith.constant 0 : index
      %c0_84 = arith.constant 0 : index
      %131 = vector.load %arg10[%c1_82, %c0_83, %c0_84] : memref<4x8x8xbf16, #tpu.memory_space<vmem>>, vector<1x8x8xbf16>
      %132 = vector.shape_cast %131 : vector<1x8x8xbf16> to vector<8x8xbf16>
      %133 = vector.shape_cast %130 : vector<8x8xbf16> to vector<1x8x8xbf16>
      tpu.vector_store %arg10[%c1_82, %c0_83, %c0_84], %133 {strides = array<i32>} : memref<4x8x8xbf16, #tpu.memory_space<vmem>>, vector<1x8x8xbf16>,
      %134 = vector.extract_strided_slice %109 {offsets = [0, 16], sizes = [8, 8], strides = [1, 1]} : vector<8x96xbf16> to vector<8x8xbf16>
      %c2_85 = arith.constant 2 : index
      %c0_86 = arith.constant 0 : index
      %c0_87 = arith.constant 0 : index
      %135 = vector.load %arg8[%c2_85, %c0_86, %c0_87] : memref<4x8x8xbf16, #tpu.memory_space<vmem>>, vector<1x8x8xbf16>
      %136 = vector.shape_cast %135 : vector<1x8x8xbf16> to vector<8x8xbf16>
      %137 = vector.shape_cast %134 : vector<8x8xbf16> to vector<1x8x8xbf16>
      tpu.vector_store %arg8[%c2_85, %c0_86, %c0_87], %137 {strides = array<i32>} : memref<4x8x8xbf16, #tpu.memory_space<vmem>>, vector<1x8x8xbf16>,
      %138 = vector.extract_strided_slice %109 {offsets = [0, 48], sizes = [8, 8], strides = [1, 1]} : vector<8x96xbf16> to vector<8x8xbf16>
      %c2_88 = arith.constant 2 : index
      %c0_89 = arith.constant 0 : index
      %c0_90 = arith.constant 0 : index
      %139 = vector.load %arg9[%c2_88, %c0_89, %c0_90] : memref<4x8x8xbf16, #tpu.memory_space<vmem>>, vector<1x8x8xbf16>
      %140 = vector.shape_cast %139 : vector<1x8x8xbf16> to vector<8x8xbf16>
      %141 = vector.shape_cast %138 : vector<8x8xbf16> to vector<1x8x8xbf16>
      tpu.vector_store %arg9[%c2_88, %c0_89, %c0_90], %141 {strides = array<i32>} : memref<4x8x8xbf16, #tpu.memory_space<vmem>>, vector<1x8x8xbf16>,
      %142 = vector.extract_strided_slice %109 {offsets = [0, 80], sizes = [8, 8], strides = [1, 1]} : vector<8x96xbf16> to vector<8x8xbf16>
      %c2_91 = arith.constant 2 : index
      %c0_92 = arith.constant 0 : index
      %c0_93 = arith.constant 0 : index
      %143 = vector.load %arg10[%c2_91, %c0_92, %c0_93] : memref<4x8x8xbf16, #tpu.memory_space<vmem>>, vector<1x8x8xbf16>
      %144 = vector.shape_cast %143 : vector<1x8x8xbf16> to vector<8x8xbf16>
      %145 = vector.shape_cast %142 : vector<8x8xbf16> to vector<1x8x8xbf16>
      tpu.vector_store %arg10[%c2_91, %c0_92, %c0_93], %145 {strides = array<i32>} : memref<4x8x8xbf16, #tpu.memory_space<vmem>>, vector<1x8x8xbf16>,
      %146 = vector.extract_strided_slice %109 {offsets = [0, 24], sizes = [8, 8], strides = [1, 1]} : vector<8x96xbf16> to vector<8x8xbf16>
      %c3_94 = arith.constant 3 : index
      %c0_95 = arith.constant 0 : index
      %c0_96 = arith.constant 0 : index
      %147 = vector.load %arg8[%c3_94, %c0_95, %c0_96] : memref<4x8x8xbf16, #tpu.memory_space<vmem>>, vector<1x8x8xbf16>
      %148 = vector.shape_cast %147 : vector<1x8x8xbf16> to vector<8x8xbf16>
      %149 = vector.shape_cast %146 : vector<8x8xbf16> to vector<1x8x8xbf16>
      tpu.vector_store %arg8[%c3_94, %c0_95, %c0_96], %149 {strides = array<i32>} : memref<4x8x8xbf16, #tpu.memory_space<vmem>>, vector<1x8x8xbf16>,
      %150 = vector.extract_strided_slice %109 {offsets = [0, 56], sizes = [8, 8], strides = [1, 1]} : vector<8x96xbf16> to vector<8x8xbf16>
      %c3_97 = arith.constant 3 : index
      %c0_98 = arith.constant 0 : index
      %c0_99 = arith.constant 0 : index
      %151 = vector.load %arg9[%c3_97, %c0_98, %c0_99] : memref<4x8x8xbf16, #tpu.memory_space<vmem>>, vector<1x8x8xbf16>
      %152 = vector.shape_cast %151 : vector<1x8x8xbf16> to vector<8x8xbf16>
      %153 = vector.shape_cast %150 : vector<8x8xbf16> to vector<1x8x8xbf16>
      tpu.vector_store %arg9[%c3_97, %c0_98, %c0_99], %153 {strides = array<i32>} : memref<4x8x8xbf16, #tpu.memory_space<vmem>>, vector<1x8x8xbf16>,
      %154 = vector.extract_strided_slice %109 {offsets = [0, 88], sizes = [8, 8], strides = [1, 1]} : vector<8x96xbf16> to vector<8x8xbf16>
      %c3_100 = arith.constant 3 : index
      %c0_101 = arith.constant 0 : index
      %c0_102 = arith.constant 0 : index
      %155 = vector.load %arg10[%c3_100, %c0_101, %c0_102] : memref<4x8x8xbf16, #tpu.memory_space<vmem>>, vector<1x8x8xbf16>
      %156 = vector.shape_cast %155 : vector<1x8x8xbf16> to vector<8x8xbf16>
      %157 = vector.shape_cast %154 : vector<8x8xbf16> to vector<1x8x8xbf16>
      tpu.vector_store %arg10[%c3_100, %c0_101, %c0_102], %157 {strides = array<i32>} : memref<4x8x8xbf16, #tpu.memory_space<vmem>>, vector<1x8x8xbf16>,
    } else {
    }
    %c8_i32 = arith.constant 8 : i32
    %3 = arith.muli %arg1, %c8_i32 : i32
    %4 = tpu.assume_multiple %3, 8 : i32
    %c0 = arith.constant 0 : index
    %5 = arith.index_cast %4 : i32 to index
    %c0_1 = arith.constant 0 : index
    %6 = vector.load %arg8[%c0, %5, %c0_1] : memref<4x8x8xbf16, #tpu.memory_space<vmem>>, vector<1x8x8xbf16>
    %7 = vector.shape_cast %6 : vector<1x8x8xbf16> to vector<8x8xbf16>
    %c0_2 = arith.constant 0 : index
    %c0_3 = arith.constant 0 : index
    %c0_4 = arith.constant 0 : index
    %8 = vector.load %arg9[%c0_2, %c0_3, %c0_4] : memref<4x8x8xbf16, #tpu.memory_space<vmem>>, vector<1x8x8xbf16>
    %9 = vector.shape_cast %8 : vector<1x8x8xbf16> to vector<8x8xbf16>
    %c0_5 = arith.constant 0 : index
    %c0_6 = arith.constant 0 : index
    %c0_7 = arith.constant 0 : index
    %10 = vector.load %arg10[%c0_5, %c0_6, %c0_7] : memref<4x8x8xbf16, #tpu.memory_space<vmem>>, vector<1x8x8xbf16>
    %11 = vector.shape_cast %10 : vector<1x8x8xbf16> to vector<8x8xbf16>
    %cst = arith.constant dense<0.000000e+00> : vector<8x8xf32>
    %12 = tpu.matmul %7, %9, %cst {dimension_numbers = #tpu.dot_dimension_numbers<[1], [1], [0], [0], [0, 0, 1, 0], [], []>} : vector<8x8xbf16>, vector<8x8xbf16>, vector<8x8xf32> -> vector<8x8xf32>
    %cst_8 = arith.constant dense<0xFF800000> : vector<8xf32>
    %13 = vector.multi_reduction <maximumf>, %12, %cst_8 [1] : vector<8x8xf32> to vector<8xf32>
    %14 = vector.shape_cast %13 : vector<8xf32> to vector<8x1xf32>
    %15 = vector.broadcast %14 : vector<8x1xf32> to vector<8x8xf32>
    %16 = arith.subf %12, %15 : vector<8x8xf32>
    %17 = math.exp %16 : vector<8x8xf32>
    %cst_9 = arith.constant dense<0.000000e+00> : vector<8xf32>
    %18 = vector.multi_reduction <add>, %17, %cst_9 [1] : vector<8x8xf32> to vector<8xf32>
    %19 = vector.shape_cast %18 : vector<8xf32> to vector<8x1xf32>
    %20 = tpu.reciprocal %19 {approx = true} : vector<8x1xf32> -> vector<8x1xf32>
    %21 = vector.broadcast %20 : vector<8x1xf32> to vector<8x8xf32>
    %22 = arith.mulf %17, %21 : vector<8x8xf32>
    %23 = arith.truncf %22 : vector<8x8xf32> to vector<8x8xbf16>
    %cst_10 = arith.constant dense<0.000000e+00> : vector<8x8xf32>
    %24 = tpu.matmul %23, %11, %cst_10 {dimension_numbers = #tpu.dot_dimension_numbers<[1], [0], [0], [1], [0, 0, 1, 1], [], []>} : vector<8x8xbf16>, vector<8x8xbf16>, vector<8x8xf32> -> vector<8x8xf32>
    %25 = arith.truncf %24 : vector<8x8xf32> to vector<8x8xbf16>
    %c0_11 = arith.constant 0 : index
    %c0_12 = arith.constant 0 : index
    %26 = vector.load %arg11[%c0_11, %c0_12] : memref<8x32xbf16, #tpu.memory_space<vmem>>, vector<8x8xbf16>
    tpu.vector_store %arg11[%c0_11, %c0_12], %25 {strides = array<i32>} : memref<8x32xbf16, #tpu.memory_space<vmem>>, vector<8x8xbf16>,
    %c1 = arith.constant 1 : index
    %27 = arith.index_cast %4 : i32 to index
    %c0_13 = arith.constant 0 : index
    %28 = vector.load %arg8[%c1, %27, %c0_13] : memref<4x8x8xbf16, #tpu.memory_space<vmem>>, vector<1x8x8xbf16>
    %29 = vector.shape_cast %28 : vector<1x8x8xbf16> to vector<8x8xbf16>
    %c1_14 = arith.constant 1 : index
    %c0_15 = arith.constant 0 : index
    %c0_16 = arith.constant 0 : index
    %30 = vector.load %arg9[%c1_14, %c0_15, %c0_16] : memref<4x8x8xbf16, #tpu.memory_space<vmem>>, vector<1x8x8xbf16>
    %31 = vector.shape_cast %30 : vector<1x8x8xbf16> to vector<8x8xbf16>
    %c1_17 = arith.constant 1 : index
    %c0_18 = arith.constant 0 : index
    %c0_19 = arith.constant 0 : index
    %32 = vector.load %arg10[%c1_17, %c0_18, %c0_19] : memref<4x8x8xbf16, #tpu.memory_space<vmem>>, vector<1x8x8xbf16>
    %33 = vector.shape_cast %32 : vector<1x8x8xbf16> to vector<8x8xbf16>
    %cst_20 = arith.constant dense<0.000000e+00> : vector<8x8xf32>
    %34 = tpu.matmul %29, %31, %cst_20 {dimension_numbers = #tpu.dot_dimension_numbers<[1], [1], [0], [0], [0, 0, 1, 0], [], []>} : vector<8x8xbf16>, vector<8x8xbf16>, vector<8x8xf32> -> vector<8x8xf32>
    %cst_21 = arith.constant dense<0xFF800000> : vector<8xf32>
    %35 = vector.multi_reduction <maximumf>, %34, %cst_21 [1] : vector<8x8xf32> to vector<8xf32>
    %36 = vector.shape_cast %35 : vector<8xf32> to vector<8x1xf32>
    %37 = vector.broadcast %36 : vector<8x1xf32> to vector<8x8xf32>
    %38 = arith.subf %34, %37 : vector<8x8xf32>
    %39 = math.exp %38 : vector<8x8xf32>
    %cst_22 = arith.constant dense<0.000000e+00> : vector<8xf32>
    %40 = vector.multi_reduction <add>, %39, %cst_22 [1] : vector<8x8xf32> to vector<8xf32>
    %41 = vector.shape_cast %40 : vector<8xf32> to vector<8x1xf32>
    %42 = tpu.reciprocal %41 {approx = true} : vector<8x1xf32> -> vector<8x1xf32>
    %43 = vector.broadcast %42 : vector<8x1xf32> to vector<8x8xf32>
    %44 = arith.mulf %39, %43 : vector<8x8xf32>
    %45 = arith.truncf %44 : vector<8x8xf32> to vector<8x8xbf16>
    %cst_23 = arith.constant dense<0.000000e+00> : vector<8x8xf32>
    %46 = tpu.matmul %45, %33, %cst_23 {dimension_numbers = #tpu.dot_dimension_numbers<[1], [0], [0], [1], [0, 0, 1, 1], [], []>} : vector<8x8xbf16>, vector<8x8xbf16>, vector<8x8xf32> -> vector<8x8xf32>
    %47 = arith.truncf %46 : vector<8x8xf32> to vector<8x8xbf16>
    %c0_24 = arith.constant 0 : index
    %c8 = arith.constant 8 : index
    %48 = vector.load %arg11[%c0_24, %c8] : memref<8x32xbf16, #tpu.memory_space<vmem>>, vector<8x8xbf16>
    tpu.vector_store %arg11[%c0_24, %c8], %47 {strides = array<i32>} : memref<8x32xbf16, #tpu.memory_space<vmem>>, vector<8x8xbf16>,
    %c2 = arith.constant 2 : index
    %49 = arith.index_cast %4 : i32 to index
    %c0_25 = arith.constant 0 : index
    %50 = vector.load %arg8[%c2, %49, %c0_25] : memref<4x8x8xbf16, #tpu.memory_space<vmem>>, vector<1x8x8xbf16>
    %51 = vector.shape_cast %50 : vector<1x8x8xbf16> to vector<8x8xbf16>
    %c2_26 = arith.constant 2 : index
    %c0_27 = arith.constant 0 : index
    %c0_28 = arith.constant 0 : index
    %52 = vector.load %arg9[%c2_26, %c0_27, %c0_28] : memref<4x8x8xbf16, #tpu.memory_space<vmem>>, vector<1x8x8xbf16>
    %53 = vector.shape_cast %52 : vector<1x8x8xbf16> to vector<8x8xbf16>
    %c2_29 = arith.constant 2 : index
    %c0_30 = arith.constant 0 : index
    %c0_31 = arith.constant 0 : index
    %54 = vector.load %arg10[%c2_29, %c0_30, %c0_31] : memref<4x8x8xbf16, #tpu.memory_space<vmem>>, vector<1x8x8xbf16>
    %55 = vector.shape_cast %54 : vector<1x8x8xbf16> to vector<8x8xbf16>
    %cst_32 = arith.constant dense<0.000000e+00> : vector<8x8xf32>
    %56 = tpu.matmul %51, %53, %cst_32 {dimension_numbers = #tpu.dot_dimension_numbers<[1], [1], [0], [0], [0, 0, 1, 0], [], []>} : vector<8x8xbf16>, vector<8x8xbf16>, vector<8x8xf32> -> vector<8x8xf32>
    %cst_33 = arith.constant dense<0xFF800000> : vector<8xf32>
    %57 = vector.multi_reduction <maximumf>, %56, %cst_33 [1] : vector<8x8xf32> to vector<8xf32>
    %58 = vector.shape_cast %57 : vector<8xf32> to vector<8x1xf32>
    %59 = vector.broadcast %58 : vector<8x1xf32> to vector<8x8xf32>
    %60 = arith.subf %56, %59 : vector<8x8xf32>
    %61 = math.exp %60 : vector<8x8xf32>
    %cst_34 = arith.constant dense<0.000000e+00> : vector<8xf32>
    %62 = vector.multi_reduction <add>, %61, %cst_34 [1] : vector<8x8xf32> to vector<8xf32>
    %63 = vector.shape_cast %62 : vector<8xf32> to vector<8x1xf32>
    %64 = tpu.reciprocal %63 {approx = true} : vector<8x1xf32> -> vector<8x1xf32>
    %65 = vector.broadcast %64 : vector<8x1xf32> to vector<8x8xf32>
    %66 = arith.mulf %61, %65 : vector<8x8xf32>
    %67 = arith.truncf %66 : vector<8x8xf32> to vector<8x8xbf16>
    %cst_35 = arith.constant dense<0.000000e+00> : vector<8x8xf32>
    %68 = tpu.matmul %67, %55, %cst_35 {dimension_numbers = #tpu.dot_dimension_numbers<[1], [0], [0], [1], [0, 0, 1, 1], [], []>} : vector<8x8xbf16>, vector<8x8xbf16>, vector<8x8xf32> -> vector<8x8xf32>
    %69 = arith.truncf %68 : vector<8x8xf32> to vector<8x8xbf16>
    %c0_36 = arith.constant 0 : index
    %c16 = arith.constant 16 : index
    %70 = vector.load %arg11[%c0_36, %c16] : memref<8x32xbf16, #tpu.memory_space<vmem>>, vector<8x8xbf16>
    tpu.vector_store %arg11[%c0_36, %c16], %69 {strides = array<i32>} : memref<8x32xbf16, #tpu.memory_space<vmem>>, vector<8x8xbf16>,
    %c3 = arith.constant 3 : index
    %71 = arith.index_cast %4 : i32 to index
    %c0_37 = arith.constant 0 : index
    %72 = vector.load %arg8[%c3, %71, %c0_37] : memref<4x8x8xbf16, #tpu.memory_space<vmem>>, vector<1x8x8xbf16>
    %73 = vector.shape_cast %72 : vector<1x8x8xbf16> to vector<8x8xbf16>
    %c3_38 = arith.constant 3 : index
    %c0_39 = arith.constant 0 : index
    %c0_40 = arith.constant 0 : index
    %74 = vector.load %arg9[%c3_38, %c0_39, %c0_40] : memref<4x8x8xbf16, #tpu.memory_space<vmem>>, vector<1x8x8xbf16>
    %75 = vector.shape_cast %74 : vector<1x8x8xbf16> to vector<8x8xbf16>
    %c3_41 = arith.constant 3 : index
    %c0_42 = arith.constant 0 : index
    %c0_43 = arith.constant 0 : index
    %76 = vector.load %arg10[%c3_41, %c0_42, %c0_43] : memref<4x8x8xbf16, #tpu.memory_space<vmem>>, vector<1x8x8xbf16>
    %77 = vector.shape_cast %76 : vector<1x8x8xbf16> to vector<8x8xbf16>
    %cst_44 = arith.constant dense<0.000000e+00> : vector<8x8xf32>
    %78 = tpu.matmul %73, %75, %cst_44 {dimension_numbers = #tpu.dot_dimension_numbers<[1], [1], [0], [0], [0, 0, 1, 0], [], []>} : vector<8x8xbf16>, vector<8x8xbf16>, vector<8x8xf32> -> vector<8x8xf32>
    %cst_45 = arith.constant dense<0xFF800000> : vector<8xf32>
    %79 = vector.multi_reduction <maximumf>, %78, %cst_45 [1] : vector<8x8xf32> to vector<8xf32>
    %80 = vector.shape_cast %79 : vector<8xf32> to vector<8x1xf32>
    %81 = vector.broadcast %80 : vector<8x1xf32> to vector<8x8xf32>
    %82 = arith.subf %78, %81 : vector<8x8xf32>
    %83 = math.exp %82 : vector<8x8xf32>
    %cst_46 = arith.constant dense<0.000000e+00> : vector<8xf32>
    %84 = vector.multi_reduction <add>, %83, %cst_46 [1] : vector<8x8xf32> to vector<8xf32>
    %85 = vector.shape_cast %84 : vector<8xf32> to vector<8x1xf32>
    %86 = tpu.reciprocal %85 {approx = true} : vector<8x1xf32> -> vector<8x1xf32>
    %87 = vector.broadcast %86 : vector<8x1xf32> to vector<8x8xf32>
    %88 = arith.mulf %83, %87 : vector<8x8xf32>
    %89 = arith.truncf %88 : vector<8x8xf32> to vector<8x8xbf16>
    %cst_47 = arith.constant dense<0.000000e+00> : vector<8x8xf32>
    %90 = tpu.matmul %89, %77, %cst_47 {dimension_numbers = #tpu.dot_dimension_numbers<[1], [0], [0], [1], [0, 0, 1, 1], [], []>} : vector<8x8xbf16>, vector<8x8xbf16>, vector<8x8xf32> -> vector<8x8xf32>
    %91 = arith.truncf %90 : vector<8x8xf32> to vector<8x8xbf16>
    %c0_48 = arith.constant 0 : index
    %c24 = arith.constant 24 : index
    %92 = vector.load %arg11[%c0_48, %c24] : memref<8x32xbf16, #tpu.memory_space<vmem>>, vector<8x8xbf16>
    tpu.vector_store %arg11[%c0_48, %c24], %91 {strides = array<i32>} : memref<8x32xbf16, #tpu.memory_space<vmem>>, vector<8x8xbf16>,
    %c0_49 = arith.constant 0 : index
    %c0_50 = arith.constant 0 : index
    %93 = vector.load %arg11[%c0_49, %c0_50] : memref<8x32xbf16, #tpu.memory_space<vmem>>, vector<8x32xbf16>
    %c0_51 = arith.constant 0 : index
    %c0_52 = arith.constant 0 : index
    %94 = vector.load %arg5[%c0_51, %c0_52] : memref<32x32xbf16, #tpu.memory_space<vmem>>, vector<32x32xbf16>
    %cst_53 = arith.constant dense<0.000000e+00> : vector<8x32xf32>
    %95 = tpu.matmul %93, %94, %cst_53 {dimension_numbers = #tpu.dot_dimension_numbers<[1], [0], [0], [1], [0, 0, 1, 1], [], []>} : vector<8x32xbf16>, vector<32x32xbf16>, vector<8x32xf32> -> vector<8x32xf32>
    %c0_54 = arith.constant 0 : index
    %c0_55 = arith.constant 0 : index
    %96 = vector.load %arg6[%c0_54, %c0_55] : memref<1x32xf32, #tpu.memory_space<vmem>>, vector<1x32xf32>
    %97 = vector.broadcast %96 : vector<1x32xf32> to vector<8x32xf32>
    %98 = arith.addf %95, %97 : vector<8x32xf32>
    %c0_56 = arith.constant 0 : index
    %c0_57 = arith.constant 0 : index
    %c0_58 = arith.constant 0 : index
    %99 = vector.load %arg7[%c0_56, %c0_57, %c0_58] : memref<1x8x32xf32, #tpu.memory_space<vmem>>, vector<1x8x32xf32>
    %100 = vector.shape_cast %99 : vector<1x8x32xf32> to vector<8x32xf32>
    %101 = vector.shape_cast %98 : vector<8x32xf32> to vector<1x8x32xf32>
    tpu.vector_store %arg7[%c0_56, %c0_57, %c0_58], %101 {strides = array<i32>} : memref<1x8x32xf32, #tpu.memory_space<vmem>>, vector<1x8x32xf32>,
    return
  }
  func.func @transform_0(%arg0: i32, %arg1: i32) -> (i32, i32, i32) {
    %c0_i32 = arith.constant 0 : i32
    %c0_i32_0 = arith.constant 0 : i32
    %c0_i32_1 = arith.constant 0 : i32
    return %arg0, %c0_i32, %c0_i32_0 : i32, i32, i32
  }
  func.func @transform_1(%arg0: i32, %arg1: i32) -> (i32, i32) {
    %c0_i32 = arith.constant 0 : i32
    %c0_i32_0 = arith.constant 0 : i32
    %c0_i32_1 = arith.constant 0 : i32
    return %c0_i32, %c0_i32_0 : i32, i32
  }
  func.func @transform_2(%arg0: i32, %arg1: i32) -> (i32, i32) {
    %c0_i32 = arith.constant 0 : i32
    %c0_i32_0 = arith.constant 0 : i32
    %c0_i32_1 = arith.constant 0 : i32
    return %c0_i32, %c0_i32_0 : i32, i32
  }
  func.func @transform_3(%arg0: i32, %arg1: i32) -> (i32, i32) {
    %c0_i32 = arith.constant 0 : i32
    %c0_i32_0 = arith.constant 0 : i32
    %c0_i32_1 = arith.constant 0 : i32
    return %c0_i32, %c0_i32_0 : i32, i32
  }
  func.func @transform_4(%arg0: i32, %arg1: i32) -> (i32, i32) {
    %c0_i32 = arith.constant 0 : i32
    %c0_i32_0 = arith.constant 0 : i32
    %c0_i32_1 = arith.constant 0 : i32
    return %c0_i32, %c0_i32_0 : i32, i32
  }
  func.func @transform_5(%arg0: i32, %arg1: i32) -> (i32, i32, i32) {
    %c0_i32 = arith.constant 0 : i32
    %c0_i32_0 = arith.constant 0 : i32
    return %arg0, %arg1, %c0_i32 : i32, i32, i32
  }
}

</mosaic_0001>

<bundles_post_ra>
// kernel: tpu_custom_call.1
= control target key start
LH: loop header
LB: loop body
LE: loop exit
PB: predicated region body
PF: predicated region fallthrough
CT: control target
= control target key end

     0   :  { %10 = vsyncpa [#allocation7], 0  ;;  %s2077_s0 = inlined_call_operand.hbm [shape: bf16[2,8,32], index: 0, kind: input, shape index: {}]   ;;  %s2078_s1 = inlined_call_operand.hbm [shape: bf16[32,96], index: 1, kind: input, shape index: {}]   ;;  %s2079_s2 = inlined_call_operand.hbm [shape: f32[1,96], index: 2, kind: input, shape index: {}]   ;;  %s2080_s3 = inlined_call_operand.hbm [shape: bf16[32,32], index: 3, kind: input, shape index: {}]   ;;  %s2081_s4 = inlined_call_operand.hbm [shape: f32[1,32], index: 4, kind: input, shape index: {}]   ;;  %s2082_s5 = inlined_call_operand.hbm [shape: f32[2,8,32], index: 5, kind: output, shape index: {}]  }
   0x1   :  { %12 = vsyncpa [#allocation7 + $0x1], 0 }
   0x2   :  { %13 = vsyncpa [#allocation10], 0 }
   0x3   :  { %14 = vsyncpa [#allocation13], 0 }
   0x4   :  { %15 = vsyncpa [#allocation8], 0 }
   0x5   :  { %17 = vsyncpa [#allocation8 + $0x1], 0  ;;  %s1695_s18 = smov 0   ;;  %s1697_s19 = smov 0  }
   0x6   :  { %s1699_s20 = smov 0   ;;  %s1701_s21 = smov 0  }
   0x7   :  { %s1703_s22 = smov 0   ;;  %s1705_s23 = smov 0  }
   0x8 LB: > { %s1132_s24 = sadd.s32 4294967295, %s1639_s23   ;;  %p1134_p0 = scmp.ge.s32.totalorder %s1639_s23, 1  ;;  %s1639_s23 = sphi %s1705_s23, %s23_s23   ;;  %s1635_s22 = sphi %s1703_s22, %s2106_s22   ;;  %s1631_s21 = sphi %s1701_s21, %s2105_s21   ;;  %s1627_s20 = sphi %s1699_s20, %s2104_s20   ;;  %s1623_s19 = sphi %s1697_s19, %s2103_s19   ;;  %s1619_s18 = sphi %s1695_s18, %s2102_s18  }
   0x9   : > { %p1729_p1 = scmp.eq.s32.totalorder %s1132_s24, 0  ;;  %p178_p2 = scmp.lt.s32.totalorder %s1639_s23, 3 }
   0xa   : > { %s1641_s27 = smov [#allocation9]   ;;  %s1642_s30 = smov [#allocation12]  }
   0xb   : > { %s2087_s25 = scalar_select %p1729_p1, 1, 0 }
   0xc   : > { %p1734_p3 = pnand %p1134_p0, %p178_p2  ;;  %s190_s28 = sshll.u32 %s1641_s27, 4  ;;  %s1738_s28 = int_to_ptr.vmem [resolvable:$true] %s190_s28 }
   0xd   : > { %s214_s6 = sshll.u32 %s1642_s30, 4  ;;  %s1643_s7 = smov [#allocation11]   ;;  %s1749_s6 = int_to_ptr.vmem [resolvable:$true] %s214_s6 }
   0xe   : > { %s2088_s26 = scalar_select %p1734_p3, 1, 0 }
   0xf   : > { %p1286_p4 = pneg %p1734_p3  ;;  %s1751_s8 = sshll.u32 %s1643_s7, 4  ;;  %s205_s8 = int_to_ptr.vmem [resolvable:$true] %s1751_s8 }
  0x10   : > { %s1407_s11 = scalar_lea.hbm %s2078_s1, 256 }
  0x11   : > { %p1745_p6 = pnand %p1286_p4, %p1729_p1  ;;  %p1408_p7 = scmp.ne.s32.totalorder %s2078_s1, %s1407_s11 }
  0x12   : > { %p1414_p11 = scmp.lt.u32.totalorder %s1407_s11, %s2078_s1 }
  0x13   : > { %p1761_p8 = pneg %p1745_p6 }
  0x15   : > { %p1410_p9 = pnand %p1761_p8, %p1408_p7 }
  0x17   : > { %p1411_p10 = pneg %p1410_p9 }
  0x19   : > { %p1416_p12 = pnand %p1414_p11, %p1411_p10 }
  0x1b   : > { %1419 = shalt.err (!%p1416_p12)
}
  0x1c   : > { %s1420_s17 = scalar_lea.vmem %s1738_s28, 256  ;;  %p1428_p4 = scmp.lt.s32.totalorder %s1738_s28, %s1738_s28 }
  0x1d   : > { %p1421_p13 = scmp.ne.s32.totalorder %s1738_s28, %s1420_s17  ;;  %p1429_p5 = scmp.lt.s32.totalorder %s1420_s17, %s1420_s17 }
  0x1f   : > { %p1423_p0 = pnand %p1421_p13, %p1761_p8  ;;  %p1430_p7 = por %p1429_p5, %p1428_p4 }
  0x21   : > { %p1424_p2 = pneg %p1423_p0 }
  0x23   : > { %p1431_p9 = pnand %p1430_p7, %p1424_p2 }
  0x25   : > { %1434 = shalt.err (!%p1431_p9)
}
  0x26   : > { %s1644_s27 = smov 64   ;;  %s1645_s30 = smov 4  }
  0x27   : > { %1289 = dma.hbm_to_vmem [thread:$0]  (!%p1745_p6), %s2078_s1, 256, %s1738_s28, [#allocation10], %s1644_s27, %s1644_s27, %s1645_s30  }
  0x28   : > { %s1435_s12 = scalar_lea.hbm %s2080_s3, 256 }
  0x29   : > { %p1436_p5 = scmp.ne.s32.totalorder %s2080_s3, %s1435_s12  ;;  %p1442_p12 = scmp.lt.u32.totalorder %s1435_s12, %s2080_s3 }
  0x2b   : > { %p1438_p10 = pnand %p1436_p5, %p1761_p8 }
  0x2d   : > { %p1439_p11 = pneg %p1438_p10 }
  0x2f   : > { %p1444_p13 = pnand %p1442_p12, %p1439_p11 }
  0x31   : > { %1447 = shalt.err (!%p1444_p13)
}
  0x32   : > { %s1448_s28 = scalar_lea.vmem %s1749_s6, 256  ;;  %p1456_p7 = scmp.lt.s32.totalorder %s1749_s6, %s1749_s6 }
  0x33   : > { %p1449_p0 = scmp.ne.s32.totalorder %s1749_s6, %s1448_s28  ;;  %p1457_p9 = scmp.lt.s32.totalorder %s1448_s28, %s1448_s28 }
  0x35   : > { %p1451_p2 = pnand %p1449_p0, %p1761_p8  ;;  %p1458_p5 = por %p1457_p9, %p1456_p7 }
  0x37   : > { %p1452_p4 = pneg %p1451_p2 }
  0x39   : > { %p1459_p10 = pnand %p1458_p5, %p1452_p4 }
  0x3b   : > { %1462 = shalt.err (!%p1459_p10)
}
  0x3c   : > { %1295 = dma.hbm_to_vmem [thread:$0]  (!%p1745_p6), %s2080_s3, 256, %s1749_s6, [#allocation13], %s1644_s27, %s1644_s27, %s1645_s30  }
  0x3d   : > { %s1463_s12 = scalar_lea.hbm %s2079_s2, 16 }
  0x3e   : > { %p1464_p11 = scmp.ne.s32.totalorder %s2079_s2, %s1463_s12  ;;  %p1470_p0 = scmp.lt.u32.totalorder %s1463_s12, %s2079_s2 }
  0x40   : > { %p1466_p12 = pnand %p1464_p11, %p1761_p8 }
  0x42   : > { %p1467_p13 = pneg %p1466_p12 }
  0x44   : > { %p1472_p2 = pnand %p1470_p0, %p1467_p13 }
  0x46   : > { %1475 = shalt.err (!%p1472_p2)
}
  0x47   : > { %s1476_s28 = scalar_lea.vmem %s205_s8, 16  ;;  %s1483_s6 = scalar_lea.vmem %s205_s8, 32 }
  0x48   : > { %p1477_p4 = scmp.ne.s32.totalorder %s205_s8, %s1476_s28  ;;  %p1484_p5 = scmp.lt.s32.totalorder %s205_s8, %s205_s8 }
  0x49   : > { %p1485_p10 = scmp.lt.s32.totalorder %s1483_s6, %s1476_s28 }
  0x4a   : > { %p1479_p7 = pnand %p1477_p4, %p1761_p8 }
  0x4b   : > { %p1486_p3 = por %p1485_p10, %p1484_p5 }
  0x4c   : > { %p1480_p9 = pneg %p1479_p7 }
  0x4e   : > { %p1487_p1 = pnand %p1486_p3, %p1480_p9 }
  0x50   : > { %1490 = shalt.err (!%p1487_p1)
}
  0x51   : > { %1292 = dma.hbm_to_vmem [thread:$0]  (!%p1745_p6), %s2079_s2, 16, %s205_s8, [#allocation10]  }
  0x52   : > { %s1646_s7 = smov [#allocation14]   ;;  %s1491_s12 = scalar_lea.hbm %s2081_s4, 16 }
  0x53   : > { %s228_s9 = sshll.u32 %s1646_s7, 4  ;;  %p1492_p11 = scmp.ne.s32.totalorder %s2081_s4, %s1491_s12  ;;  %s229_s9 = int_to_ptr.vmem [resolvable:$true] %s228_s9 }
  0x54   : > { %p1498_p12 = scmp.lt.u32.totalorder %s1491_s12, %s2081_s4 }
  0x55   : > { %p1494_p1 = pnand %p1492_p11, %p1761_p8 }
  0x57   : > { %p1495_p3 = pneg %p1494_p1 }
  0x59   : > { %p1500_p13 = pnand %p1498_p12, %p1495_p3 }
  0x5b   : > { %1503 = shalt.err (!%p1500_p13)
}
  0x5c   : > { %s1504_s8 = scalar_lea.vmem %s229_s9, 16  ;;  %s1511_s28 = scalar_lea.vmem %s229_s9, 32 }
  0x5d   : > { %p1505_p0 = scmp.ne.s32.totalorder %s229_s9, %s1504_s8  ;;  %p1512_p7 = scmp.lt.s32.totalorder %s229_s9, %s229_s9 }
  0x5e   : > { %p1513_p9 = scmp.lt.s32.totalorder %s1511_s28, %s1504_s8 }
  0x5f   : > { %p1507_p2 = pnand %p1505_p0, %p1761_p8 }
  0x60   : > { %p1514_p5 = por %p1513_p9, %p1512_p7 }
  0x61   : > { %p1508_p4 = pneg %p1507_p2 }
  0x63   : > { %p1515_p10 = pnand %p1514_p5, %p1508_p4 }
  0x65   : > { %1518 = shalt.err (!%p1515_p10)
}
  0x66   : > { %1298 = dma.hbm_to_vmem [thread:$0]  (!%p1745_p6), %s2081_s4, 16, %s229_s9, [#allocation13]  }
  0x67   : > { %s1133_s14 = sadd.s32 4294967294, %s1639_s23   ;;  %s35_s30 = sadd.s32 1, %s1635_s22 }
  0x68   : > { %p37_p8 = scmp.ge.s32.totalorder %s35_s30, 2  ;;  %s42_s29 = sadd.s32 1, %s1627_s20 }
  0x69   : > { %p49_p11 = scmp.ne.s32.totalorder %s1627_s20, %s1623_s19  ;;  %p50_p1 = scmp.eq.s32.totalorder %s1639_s23, 0 }
  0x6a   : > { %s2108_s30 = smov (%p37_p8, %s35_s30), 0  ;;  %p55_p12 = scmp.ne.s32.totalorder %s1623_s19, %s1619_s18 }
  0x6b   : > { %p1850_p3 = por %p50_p1, %p49_p11  ;;  %s39_s9 = ssub.s32 %s1635_s22, %s2108_s30 }
  0x6c   : > { %p165_p6 = scmp.eq.s32.totalorder %s1132_s24, 1  ;;  %p40_p13 = scmp.eq.s32.totalorder %s39_s9, 0 }
  0x6d   : > { %p2092_p0 = scmp.ne.s32.totalorder %s2087_s25, 0  ;;  %p171_p7 = scmp.eq.s32.totalorder %s1133_s14, 1 }
  0x6e   : > { %p1866_p4 = por %p165_p6, %p49_p11  ;;  %p1311_p5 = scmp.lt.s32.totalorder %s1639_s23, 2 }
  0x6f   : > { %p1862_p2 = por %p2092_p0, %p55_p12  ;;  %p1873_p9 = por %p171_p7, %p55_p12 }
  0x70   : > { %s2094_s11 = scalar_select %p1866_p4, 1, 0 }
  0x71   : > { %s1871_s12 = scalar_select %p40_p13, %s1627_s20, %s42_s29  }
  0x72   : > { %s2095_s13 = scalar_select %p1873_p9, 1, 0 }
  0x73   : > { %s239_s15 = sand.u32 1, %s1627_s20   ;;  %s1141_s24 = sshll.u32 %s1635_s22, 6 }
  0x74   : > { %s1140_s16 = sshll.u32 %s239_s15, 2  ;;  %s1883_s28 = scalar_lea.hbm %s2077_s0, %s1141_s24 }
  0x75   : > { %s243_s6 = scalar_lea.vmem [#allocation6], %s1140_s16  ;;  %p1887_p10 = pnand %p1311_p5, %p1850_p3 }
  0x76   : > { %s250_s27 = sshll.u32 %s243_s6, 4  ;;  %s240_s29 = scalar_lea.sflag [#allocation7], %s239_s15  ;;  %s1891_s27 = int_to_ptr.vmem [resolvable:$true] %s250_s27 }
  0x77   : > { %s1519_s9 = scalar_lea.hbm %s1883_s28, 64  ;;  %p1521_p11 = pneg %p1887_p10 }
  0x78   : > { %p1520_p8 = scmp.ne.s32.totalorder %s1883_s28, %s1519_s9  ;;  %s1524_s7 = scalar_lea.hbm %s2077_s0, 128 }
  0x79   : > { %p1525_p3 = scmp.lt.u32.totalorder %s1883_s28, %s2077_s0  ;;  %p1526_p6 = scmp.lt.u32.totalorder %s1524_s7, %s1519_s9 }
  0x7a   : > { %p1522_p1 = pnand %p1521_p11, %p1520_p8  ;;  %p1528_p0 = scmp.lt.u32.totalorder %s1519_s9, %s1883_s28 }
  0x7b   : > { %p1527_p13 = por %p1526_p6, %p1525_p3 }
  0x7c   : > { %p1523_p12 = pneg %p1522_p1 }
  0x7d   : > { %p1529_p7 = por %p1528_p0, %p1527_p13 }
  0x7f   : > { %p1530_p5 = pnand %p1529_p7, %p1523_p12 }
  0x81   : > { %1533 = shalt.err (!%p1530_p5)
}
  0x82   : > { %s1534_s15 = scalar_lea.vmem %s1891_s27, 64  ;;  %s1647_s6 = smov [#allocation6]  }
  0x83   : > { %p1535_p8 = scmp.ne.s32.totalorder %s1891_s27, %s1534_s15  ;;  %s1539_s24 = sshll.u32 %s1647_s6, 4  ;;  %s1540_s24 = int_to_ptr.vmem [resolvable:$false] %s1539_s24 }
  0x84   : > { %s1541_s16 = scalar_lea.vmem %s1540_s24, 128  ;;  %p1542_p4 = scmp.lt.s32.totalorder %s1891_s27, %s1540_s24 }
  0x85   : > { %p1537_p1 = pnand %p1535_p8, %p1521_p11  ;;  %p1543_p3 = scmp.lt.s32.totalorder %s1541_s16, %s1534_s15 }
  0x87   : > { %p1538_p9 = pneg %p1537_p1  ;;  %p1544_p6 = por %p1543_p3, %p1542_p4 }
  0x89   : > { %p1545_p13 = pnand %p1544_p6, %p1538_p9 }
  0x8b   : > { %1548 = shalt.err (!%p1545_p13)
}
  0x8c   : > { %1302 = dma.hbm_to_vmem [thread:$0]  (!%p1887_p10), %s1883_s28, 64, %s1891_s27, %s240_s29  }
  0x8d   : > { %p2097_p12 = scmp.ne.s32.totalorder %s2088_s26, 0 }
  0x8e   : > { %s1921_s9 = sand.u32 (!%p2097_p12), 1, %s1623_s19  }
  0x8f   : > { %259 = sbr.rel (%p2097_p12) target bundleno = 1647 (0x66f), region = 40  ;;  %s1143_s7 = sshll.u32 (!%p2097_p12), %s1921_s9, 2 }
  0x90   : > { %s262_s17 = scalar_lea.sflag (!%p2097_p12), [#allocation7], %s1921_s9  ;;  %s265_s8 = scalar_lea.vmem (!%p2097_p12), [#allocation6], %s1143_s7 }
  0x96   : > { %1602 = dma.done.wait (%p1862_p2), %s262_s17, 64  }
  0x97   : > { %1604 = vsyncadd (%p1862_p2), %s262_s17, 4294967232  ;;  %p2098_p4 = scmp.ne.s32.totalorder %s2087_s25, 0 }
  0x99   : > { %1606 = dma.done.wait (%p2098_p4), [#allocation10], 272  }
  0x9a   : > { %1608 = vsyncadd (%p2098_p4), [#allocation10], 4294967024 }
  0x9b   : > { %1610 = dma.done.wait (%p2098_p4), [#allocation13], 272  }
  0x9c   : > { %1612 = vsyncadd (%p2098_p4), [#allocation13], 4294967024  ;;  %v1648_v0 = vmov 0.0   ;;  %vm1649_vm0 = vmmov 0   ;;  %v1387_v1 = vld [vmem:[#allocation9] sm:$0xff]   ;;  %v1388_v2 = vld [vmem:[#allocation9 + $0x8] sm:$0xff]  }
  0x9d   : > { %1202 = vmatprep.subr.bf16.mxu0 %v1648_v0  ;;  %1206 = vmatprep.mubr.msk.bf16.mxu0 %vm1649_vm0, %v1648_v0  ;;  %v313_v3 = vld [vmem:[%s265_s8] sm:$0xf]  ;;  %vm337_vm1 = vcmask 261120   ;;  %v1149_v4 = vld [vmem:[#allocation11] ss:$0 sm:$0xff]  ;;  %vm382_vm2 = vcmask 60416  }
  0x9e   : > { %1210 = vmatprep.subr.bf16.mxu1 %v1648_v0  ;;  %1212 = vmatprep.mubr.msk.bf16.mxu1 %vm1649_vm0, %v1648_v0  ;;  %s1650_s25 = smov 120   ;;  %s1651_s26 = smov 96   ;;  %vm448_vm3 = vcmask 64512   ;;  %vm510_vm4 = vcmask 1043456   ;;  %vm676_vm5 = vcmask 126016   ;;  %vm797_vm6 = vcmask 191616  }
  0x9f   : > { %1203 = vmatpush3.bf16.msra.mxu0 %v1387_v1  ;;  %s1652_s10 = smov 80   ;;  %s1653_s28 = smov 88   ;;  %vm918_vm7 = vcmask 257216  }
  0xa0   : > { %1204 = vmatprep.subr.bf16.mxu0 %v1648_v0  ;;  %s1654_s27 = smov 72   ;;  %s1655_s14 = smov 112  }
  0xa1   : > { %s1656_s29 = smov 104   ;;  %s1657_s15 = smov 64  }
  0xa2   : > { %s1658_s6 = smov 48   ;;  %s1659_s24 = smov 40  }
  0xa3   : > { %1205 = vmatpush3.bf16.msra.mxu0 %v1388_v2  ;;  %s1660_s16 = smov 56   ;;  %s1661_s7 = smov 8  }
  0xa4   : > { %1216 = vmatprep.subr.bf16.mxu0 %v1648_v0  ;;  %s1662_s17 = smov 16   ;;  %s1663_s8 = smov 24  }
  0xa5   : > { %p2099_p9 = scmp.ne.s32.totalorder %s2094_s11, 0 }
  0xa6   : > { %1207 = vmatmul.mubr.msk.bf16.vlgmr.msra.gmra.mrb[0].mxu0 %vm337_vm1, %v313_v3 }
  0xa7   : > { %1218 = vmatprep.mubr.msk.bf16.mxu0 %vm1649_vm0, %v1648_v0 }
 0x179   : > { %v375_v5 = vpop.f32.mrb[0].mxu0 }
 0x17a   : > { %v376_v6 = vadd.f32 %v1149_v4, %v375_v5  ;;  %v1208_v7 = vpop.f32.mrb[1].mxu0 }
 0x17b   : > { %v378_v8 = vpop.f32.mrb[2].mxu0 }
 0x17c   : > { %v1948_v9 = vpack.c.bf16 %v376_v6, %v376_v6  ;;  %v1209_v10 = vpop.f32.mrb[3].mxu0 }
 0x17e   : > { %395 = vrot.lane.b32.xlu1 %v1948_v9, %s1650_s25  ;;  %387 = vrot.lane.b32.xlu0 %v1948_v9, %s1651_s26  ;;  %383 = vst.msk [vmem:[#allocation2] sm:$0xf] %vm382_vm2, %v1948_v9  ;;  %s1148_s25 = sshll.u32 %s1921_s9, 3  ;;  %s1173_s26 = sshll.u32 %s1631_s21, 7 }
 0x17f   : > { %s990_s21 = scalar_lea.sflag [#allocation8], %s1921_s9 }
 0x182   : > { %415 = vrot.lane.b32.xlu1 %v1948_v9, %s1652_s10  ;;  %400 = vrot.lane.b32.xlu0 %v1948_v9, %s1653_s28  ;;  %s307_s10 = scalar_lea.vmem [#allocation15], %s1148_s25 }
 0x183   : > { %s1004_s28 = sshll.u32 %s307_s10, 4  ;;  %s2029_s28 = int_to_ptr.vmem [resolvable:$true] %s1004_s28 }
 0x185   : > { %v445_v21 = vld [vmem:[#allocation2] sm:$0xf] }
 0x186   : > { %430 = vrot.lane.b32.xlu1 %v1948_v9, %s1654_s27  ;;  %410 = vrot.lane.b32.xlu0 %v1948_v9, %s1655_s14 }
 0x18a   : > { %425 = vrot.lane.b32.xlu0 %v1948_v9, %s1656_s29  ;;  %s2027_s29 = scalar_lea.hbm %s2082_s5, %s1173_s26 }
 0x1f0   : > { %v396_v11 = vpop.permute.xlu1 %395  ;;  %v388_v12 = vpop.permute.xlu0 %387 }
 0x1f1   : > { %399 = vst.msk [vmem:[#allocation2 + $0x4] sm:$0xf] %vm382_vm2, %v396_v11  ;;  %390 = vst.msk [vmem:[#allocation3] sm:$0xf] %vm382_vm2, %v388_v12 }
 0x1f4   : > { %v416_v13 = vpop.permute.xlu1 %415  ;;  %v401_v14 = vpop.permute.xlu0 %400 }
 0x1f5   : > { %419 = vst.msk [vmem:[#allocation3 + $0x8] sm:$0xf] %vm382_vm2, %v416_v13  ;;  %404 = vst.msk [vmem:[#allocation3 + $0x4] sm:$0xf] %vm382_vm2, %v401_v14 }
 0x1f8   : > { %v431_v15 = vpop.permute.xlu1 %430  ;;  %v411_v16 = vpop.permute.xlu0 %410  ;;  %v446_v17 = vld [vmem:[#allocation3] sm:$0xf]  ;;  %v1156_v24 = vld [vmem:[#allocation2 + $0x4] sm:$0xf] }
 0x1f9   : > { %434 = vst.msk [vmem:[#allocation3 + $0xc] sm:$0xf] %vm382_vm2, %v431_v15  ;;  %414 = vst.msk [vmem:[#allocation2 + $0x8] sm:$0xf] %vm382_vm2, %v411_v16  ;;  %v453_v18 = vsel %vm448_vm3, %v446_v17, 0 }
 0x1fa   : > { %1211 = vmatpush3.bf16.xpose.msra.mxu1 %v453_v18 }
 0x1fb   : > { %1222 = vmatprep.subr.bf16.mxu1 %v1648_v0 }
 0x1fc   : > { %v426_v19 = vpop.permute.xlu0 %425  ;;  %v562_v20 = vld [vmem:[#allocation3 + $0x4] sm:$0xf]  ;;  %v683_v23 = vld [vmem:[#allocation3 + $0x8] sm:$0xf] }
 0x1fd   : > { %429 = vst.msk [vmem:[#allocation2 + $0xc] sm:$0xf] %vm382_vm2, %v426_v19  ;;  %v569_v22 = vsel %vm448_vm3, %v562_v20, 0  ;;  %v690_v25 = vsel %vm448_vm3, %v683_v23, 0 }
 0x200   : > { %v804_v26 = vld [vmem:[#allocation3 + $0xc] sm:$0xf]  ;;  %v1160_v27 = vld [vmem:[#allocation2 + $0x8] sm:$0xf] }
 0x201   : > { %1213 = vmatmul.mubr.msk.bf16.vlgmr.msra.gmra.mrb[0].mxu1 %vm448_vm3, %v445_v21  ;;  %v811_v28 = vsel %vm448_vm3, %v804_v26, 0 }
 0x202   : > { %1223 = vmatpush3.bf16.xpose.msra.mxu1 %v569_v22  ;;  %1224 = vmatprep.mubr.msk.bf16.mxu1 %vm1649_vm0, %v1648_v0 }
 0x203   : > { %1234 = vmatprep.subr.bf16.mxu1 %v1648_v0 }
 0x204   : > { %v1164_v29 = vld [vmem:[#allocation2 + $0xc] sm:$0xf] }
 0x209   : > { %1225 = vmatmul.mubr.msk.bf16.vlgmr.msra.gmra.mrb[4].mxu1 %vm448_vm3, %v1156_v24 }
 0x20a   : > { %1235 = vmatpush3.bf16.xpose.msra.mxu1 %v690_v25  ;;  %1236 = vmatprep.mubr.msk.bf16.mxu1 %vm1649_vm0, %v1648_v0 }
 0x20b   : > { %1246 = vmatprep.subr.bf16.mxu1 %v1648_v0 }
 0x211   : > { %1237 = vmatmul.mubr.msk.bf16.vlgmr.msra.gmra.mrb[8].mxu1 %vm448_vm3, %v1160_v27 }
 0x212   : > { %1247 = vmatpush3.bf16.xpose.msra.mxu1 %v811_v28  ;;  %1248 = vmatprep.mubr.msk.bf16.mxu1 %vm1649_vm0, %v1648_v0 }
 0x213   : > { %1258 = vmatprep.subr.bf16.mxu1 %v1648_v0 }
 0x219   : > { %1249 = vmatmul.mubr.msk.bf16.vlgmr.msra.gmra.mrb[12].mxu1 %vm448_vm3, %v1164_v29 }
 0x21a   : > { %1262 = vmatprep.mubr.msk.bf16.mxu1 %vm1649_vm0, %v1648_v0 }
 0x2d4   : > { %v489_v30 = vpop.f32.mrb[0].mxu1 }
 0x2d5   : > { %v1214_v31 = vpop.f32.mrb[1].mxu1  ;;  %v495_v32 = vsel %vm448_vm3, %v489_v30, -inf }
 0x2d6   : > { %496 = vmax.xlane.f32.xlu1 %v495_v32  ;;  %v492_v33 = vpop.f32.mrb[2].mxu1 }
 0x2d7   : > { %v1215_v34 = vpop.f32.mrb[3].mxu1 }
 0x2dc   : > { %v605_v35 = vpop.f32.mrb[4].mxu1 }
 0x2dd   : > { %v1226_v36 = vpop.f32.mrb[5].mxu1  ;;  %v611_v37 = vsel %vm448_vm3, %v605_v35, -inf }
 0x2de   : > { %612 = vmax.xlane.f32.xlu0 %v611_v37  ;;  %v608_v38 = vpop.f32.mrb[6].mxu1 }
 0x2df   : > { %v1227_v39 = vpop.f32.mrb[7].mxu1 }
 0x2e4   : > { %v726_v40 = vpop.f32.mrb[8].mxu1 }
 0x2e5   : > { %v1238_v41 = vpop.f32.mrb[9].mxu1  ;;  %v732_v42 = vsel %vm448_vm3, %v726_v40, -inf }
 0x2e6   : > { %733 = vmax.xlane.f32.xlu0 %v732_v42  ;;  %v729_v43 = vpop.f32.mrb[10].mxu1 }
 0x2e7   : > { %v1239_v44 = vpop.f32.mrb[11].mxu1 }
 0x2ec   : > { %v847_v45 = vpop.f32.mrb[12].mxu1 }
 0x2ed   : > { %v1250_v46 = vpop.f32.mrb[13].mxu1  ;;  %v853_v47 = vsel %vm448_vm3, %v847_v45, -inf }
 0x2ee   : > { %854 = vmax.xlane.f32.xlu1 %v853_v47  ;;  %v850_v48 = vpop.f32.mrb[14].mxu1  ;;  %v1390_v47 = vld [vmem:[#allocation12 + $0x8] sm:$0xff]  }
 0x2ef   : > { %v1251_v49 = vpop.f32.mrb[15].mxu1 }
 0x2ff   : > { %391 = vrot.lane.b32.xlu1 %v1948_v9, %s1657_s15  ;;  %s1549_s15 = scalar_lea.vmem %s2029_s28, 128 }
 0x300   : > { %p1550_p2 = scmp.ne.s32.totalorder %s2029_s28, %s1549_s15 }
 0x302   : > { %p1551_p10 = pnand %p1550_p2, %p2099_p9 }
 0x304   : > { %p1552_p11 = pneg %p1551_p10 }
 0x363   : > { %v497_v50 = vpop.xlane.xlu1 %496 }
 0x364   : > { %v498_v51 = vsub.f32 %v489_v30, %v497_v50 }
 0x366   : > { %v499_v52 = vmul.f32 1.442695, %v498_v51 }
 0x368   : > { %1391 = vpow2.f32 %v499_v52 }
 0x36b   : > { %v613_v53 = vpop.xlane.xlu0 %612 }
 0x36c   : > { %v614_v54 = vsub.f32 %v605_v35, %v613_v53 }
 0x36e   : > { %v615_v55 = vmul.f32 1.442695, %v614_v54 }
 0x370   : > { %1393 = vpow2.f32 %v615_v55 }
 0x372   : > { %v1392_v56 = vpop.eup %1391 }
 0x373   : > { %v734_v57 = vpop.xlane.xlu0 %733  ;;  %v501_v58 = vsel %vm448_vm3, %v1392_v56, 0.0 }
 0x374   : > { %v735_v59 = vsub.f32 %v726_v40, %v734_v57  ;;  %502 = vadd.xlane.f32.xlu0 %v501_v58 }
 0x376   : > { %v736_v60 = vmul.f32 1.442695, %v735_v59 }
 0x378   : > { %1395 = vpow2.f32 %v736_v60  ;;  %v1168_v60 = vld [vmem:[#allocation14] ss:$0 sm:$0xff] }
 0x37a   : > { %v1394_v61 = vpop.eup %1393 }
 0x37b   : > { %v855_v62 = vpop.xlane.xlu1 %854  ;;  %v617_v63 = vsel %vm448_vm3, %v1394_v61, 0.0 }
 0x37c   : > { %v856_v1 = vsub.f32 %v847_v45, %v855_v62  ;;  %618 = vadd.xlane.f32.xlu1 %v617_v63  ;;  %v1389_v45 = vld [vmem:[#allocation12] sm:$0xff]  }
 0x37d   : > { %1259 = vmatpush3.bf16.msra.mxu1 %v1389_v45 }
 0x37e   : > { %v857_v2 = vmul.f32 1.442695, %v856_v1  ;;  %1260 = vmatprep.subr.bf16.mxu1 %v1648_v0 }
 0x37f   : > { %v392_v3 = vpop.permute.xlu1 %391 }
 0x380   : > { %1397 = vpow2.f32 %v857_v2  ;;  %394 = vst.msk [vmem:[#allocation4] sm:$0xf] %vm382_vm2, %v392_v3 }
 0x381   : > { %1261 = vmatpush3.bf16.msra.mxu1 %v1390_v47 }
 0x382   : > { %v1396_v4 = vpop.eup %1395 }
 0x383   : > { %v738_v5 = vsel %vm448_vm3, %v1396_v4, 0.0 }
 0x384   : > { %739 = vadd.xlane.f32.xlu0 %v738_v5 }
 0x387   : > { %v447_v6 = vld [vmem:[#allocation4] sm:$0xf] }
 0x388   : > { %v512_v7 = vsel %vm510_vm4, %v447_v6, 0 }
 0x389   : > { %1217 = vmatpush3.bf16.msra.mxu0 %v512_v7 }
 0x38a   : > { %v1398_v8 = vpop.eup %1397  ;;  %1228 = vmatprep.subr.bf16.mxu0 %v1648_v0 }
 0x38b   : > { %v859_v10 = vsel %vm448_vm3, %v1398_v8, 0.0 }
 0x38c   : > { %860 = vadd.xlane.f32.xlu0 %v859_v10 }
 0x38d   : > { %420 = vrot.lane.b32.xlu1 %v1948_v9, %s1658_s6  ;;  %s1664_s6 = smov [#allocation15]  }
 0x391   : > { %435 = vrot.lane.b32.xlu1 %v1948_v9, %s1659_s24  ;;  %s1553_s24 = sshll.u32 %s1664_s6, 4  ;;  %s1554_s24 = int_to_ptr.vmem [resolvable:$false] %s1553_s24 }
 0x392   : > { %p1556_p0 = scmp.lt.s32.totalorder %s2029_s28, %s1554_s24 }
 0x3a2   : > { %405 = vrot.lane.b32.xlu0 %v1948_v9, %s1660_s16  ;;  %s1555_s16 = scalar_lea.vmem %s1554_s24, 256 }
 0x3a3   : > { %p1557_p7 = scmp.lt.s32.totalorder %s1555_s16, %s1549_s15 }
 0x3a5   : > { %p1558_p5 = por %p1557_p7, %p1556_p0 }
 0x3a7   : > { %p1559_p8 = pnand %p1558_p5, %p1552_p11 }
 0x401   : > { %v503_v11 = vpop.xlane.xlu0 %502 }
 0x402   : > { %1399 = vrcp.f32 %v503_v11 }
 0x409   : > { %v619_v12 = vpop.xlane.xlu1 %618 }
 0x40a   : > { %1401 = vrcp.f32 %v619_v12 }
 0x40c   : > { %v1400_v13 = vpop.eup %1399 }
 0x40d   : > { %v505_v14 = vmul.f32 %v1400_v13, %v1392_v56  ;;  %v421_v15 = vpop.permute.xlu1 %420 }
 0x40e   : > { %424 = vst.msk [vmem:[#allocation4 + $0x8] sm:$0xf] %vm382_vm2, %v421_v15 }
 0x40f   : > { %v506_v16 = vpack.c.bf16 %v505_v14, %v505_v14 }
 0x411   : > { %1219 = vmatmul.mubr.msk.bf16.vlgmr.msra.gmra.mrb[4].mxu0 %vm448_vm3, %v506_v16  ;;  %v436_v17 = vpop.permute.xlu1 %435  ;;  %v740_v18 = vpop.xlane.xlu0 %739 }
 0x412   : > { %439 = vst.msk [vmem:[#allocation4 + $0xc] sm:$0xf] %vm382_vm2, %v436_v17  ;;  %1230 = vmatprep.mubr.msk.bf16.mxu0 %vm1649_vm0, %v1648_v0  ;;  %1403 = vrcp.f32 %v740_v18 }
 0x414   : > { %v1402_v20 = vpop.eup %1401 }
 0x415   : > { %v621_v21 = vmul.f32 %v1402_v20, %v1394_v61  ;;  %v685_v24 = vld [vmem:[#allocation4 + $0x8] sm:$0xf] }
 0x416   : > { %v748_v27 = vsel %vm510_vm4, %v685_v24, 0 }
 0x417   : > { %v622_v25 = vpack.c.bf16 %v621_v21, %v621_v21 }
 0x419   : > { %v861_v9 = vpop.xlane.xlu0 %860  ;;  %v806_v29 = vld [vmem:[#allocation4 + $0xc] sm:$0xf] }
 0x41a   : > { %1405 = vrcp.f32 %v861_v9  ;;  %v869_v32 = vsel %vm510_vm4, %v806_v29, 0 }
 0x41c   : > { %v1404_v26 = vpop.eup %1403 }
 0x41d   : > { %v406_v19 = vpop.permute.xlu0 %405  ;;  %v742_v28 = vmul.f32 %v1404_v26, %v1396_v4 }
 0x41e   : > { %409 = vst.msk [vmem:[#allocation4 + $0x4] sm:$0xf] %vm382_vm2, %v406_v19 }
 0x41f   : > { %v743_v30 = vpack.c.bf16 %v742_v28, %v742_v28 }
 0x424   : > { %v1406_v31 = vpop.eup %1405 }
 0x425   : > { %v564_v22 = vld [vmem:[#allocation4 + $0x4] sm:$0xf]  ;;  %v863_v33 = vmul.f32 %v1406_v31, %v1398_v8 }
 0x426   : > { %v627_v23 = vsel %vm510_vm4, %v564_v22, 0 }
 0x427   : > { %1229 = vmatpush3.bf16.msra.mxu0 %v627_v23  ;;  %v864_v34 = vpack.c.bf16 %v863_v33, %v863_v33 }
 0x428   : > { %1240 = vmatprep.subr.bf16.mxu0 %v1648_v0 }
 0x42a   : > { %1231 = vmatmul.mubr.msk.bf16.vlgmr.msra.gmra.mrb[8].mxu0 %vm448_vm3, %v622_v25 }
 0x42b   : > { %1241 = vmatpush3.bf16.msra.mxu0 %v748_v27  ;;  %1242 = vmatprep.mubr.msk.bf16.mxu0 %vm1649_vm0, %v1648_v0 }
 0x42c   : > { %1252 = vmatprep.subr.bf16.mxu0 %v1648_v0 }
 0x432   : > { %1243 = vmatmul.mubr.msk.bf16.vlgmr.msra.gmra.mrb[12].mxu0 %vm448_vm3, %v743_v30 }
 0x433   : > { %1253 = vmatpush3.bf16.msra.mxu0 %v869_v32  ;;  %1254 = vmatprep.mubr.msk.bf16.mxu0 %vm1649_vm0, %v1648_v0 }
 0x43a   : > { %1255 = vmatmul.mubr.msk.bf16.vlgmr.msra.gmra.mrb[16].mxu0 %vm448_vm3, %v864_v34 }
 0x4e4   : > { %v548_v35 = vpop.f32.mrb[4].mxu0 }
 0x4e5   : > { %v554_v36 = vpack.c.bf16 %v548_v35, %v548_v35  ;;  %v1220_v37 = vpop.f32.mrb[5].mxu0 }
 0x4e6   : > { %v551_v38 = vpop.f32.mrb[6].mxu0 }
 0x4e7   : > { %556 = vst.msk [vmem:[#allocation5] sm:$0xf] %vm382_vm2, %v554_v36  ;;  %v1221_v39 = vpop.f32.mrb[7].mxu0 }
 0x4fd   : > { %v663_v40 = vpop.f32.mrb[8].mxu0 }
 0x4fe   : > { %v1177_v41 = vpack.c.bf16 %v663_v40, %v663_v40  ;;  %v1232_v42 = vpop.f32.mrb[9].mxu0 }
 0x4ff   : > { %v666_v43 = vpop.f32.mrb[10].mxu0 }
 0x500   : > { %673 = vrot.lane.b32.xlu1 %v1177_v41, %s1661_s7  ;;  %v1233_v44 = vpop.f32.mrb[11].mxu0 }
 0x505   : > { %v784_v46 = vpop.f32.mrb[12].mxu0 }
 0x506   : > { %v1178_v48 = vpack.c.bf16 %v784_v46, %v784_v46  ;;  %v1244_v49 = vpop.f32.mrb[13].mxu0 }
 0x507   : > { %v787_v50 = vpop.f32.mrb[14].mxu0 }
 0x508   : > { %794 = vrot.lane.b32.xlu0 %v1178_v48, %s1662_s17  ;;  %v1245_v51 = vpop.f32.mrb[15].mxu0 }
 0x50d   : > { %v905_v52 = vpop.f32.mrb[16].mxu0 }
 0x50e   : > { %v1179_v53 = vpack.c.bf16 %v905_v52, %v905_v52  ;;  %v1256_v54 = vpop.f32.mrb[17].mxu0 }
 0x50f   : > { %v908_v55 = vpop.f32.mrb[18].mxu0 }
 0x510   : > { %915 = vrot.lane.b32.xlu1 %v1179_v53, %s1663_s8  ;;  %v1257_v56 = vpop.f32.mrb[19].mxu0 }
 0x572   : > { %v674_v57 = vpop.permute.xlu1 %673 }
 0x573   : > { %677 = vst.msk [vmem:[#allocation5] sm:$0xf] %vm676_vm5, %v674_v57 }
 0x57a   : > { %v795_v58 = vpop.permute.xlu0 %794 }
 0x57b   : > { %798 = vst.msk [vmem:[#allocation5] sm:$0xf] %vm797_vm6, %v795_v58 }
 0x582   : > { %v916_v0 = vpop.permute.xlu1 %915 }
 0x583   : > { %919 = vst.msk [vmem:[#allocation5] sm:$0xf] %vm918_vm7, %v916_v0 }
 0x58a   : > { %v920_v59 = vld [vmem:[#allocation5] sm:$0xf] }
 0x58b   : > { %1263 = vmatmul.mubr.msk.bf16.vlgmr.msra.gmra.mrb[16].mxu1 %vm337_vm1, %v920_v59 }
 0x65e   : > { %v982_v61 = vpop.f32.mrb[16].mxu1 }
 0x65f   : > { %v983_v62 = vadd.f32 %v1168_v60, %v982_v61  ;;  %v1264_v63 = vpop.f32.mrb[17].mxu1 }
 0x660   : > { %v985_v1 = vpop.f32.mrb[18].mxu1 }
 0x661   : > { %v1265_v2 = vpop.f32.mrb[19].mxu1  ;;  %988 = vst.msk [vmem:[%s307_s10] sm:$0xff] %vm337_vm1, %v983_v62 }
 0x662   : > { %1562 = shalt.err (!%p1559_p8)
}
 0x663   : > { %s1563_s9 = scalar_lea.hbm %s2027_s29, 128  ;;  %s1567_s8 = scalar_lea.hbm %s2082_s5, 256 }
 0x664   : > { %p1564_p1 = scmp.ne.s32.totalorder %s2027_s29, %s1563_s9  ;;  %p1568_p13 = scmp.lt.u32.totalorder %s2027_s29, %s2082_s5 }
 0x665   : > { %p1569_p12 = scmp.lt.u32.totalorder %s1567_s8, %s1563_s9  ;;  %p1571_p2 = scmp.lt.u32.totalorder %s1563_s9, %s2027_s29 }
 0x666   : > { %p1565_p3 = pnand %p1564_p1, %p2099_p9 }
 0x667   : > { %p1570_p4 = por %p1569_p12, %p1568_p13 }
 0x668   : > { %p1566_p6 = pneg %p1565_p3 }
 0x669   : > { %p1572_p10 = por %p1571_p2, %p1570_p4 }
 0x66b   : > { %p1573_p11 = pnand %p1572_p10, %p1566_p6 }
 0x66d   : > { %1576 = shalt.err (!%p1573_p11)
}
 0x66e   : > { %1284 = dma.vmem_to_hbm [thread:$0]  (%p2099_p9), %s2029_s28, 128, %s2027_s29, %s990_s21  }
 0x66f PF: > { %s1016_s10 = sand.u32 1, %s1619_s18   ;;  %p2100_p0 = scmp.ne.s32.totalorder %s2095_s13, 0 }
 0x670   : > { %p2101_p7 = scmp.ge.s32.totalorder %s1639_s23, 2  ;;  %s1017_s27 = scalar_lea.sflag [#allocation8], %s1016_s10 }
 0x672   : > { %p1304_p5 = pnand %p2101_p7, %p2100_p0 }
 0x674   : > { %1614 = dma.done.wait (!%p1304_p5), %s1017_s27, 128  }
 0x675   : > { %1616 = vsyncadd (!%p1304_p5), %s1017_s27, 4294967168  ;;  %s23_s23 = sadd.s32 1, %s1639_s23   ;;  %s2102_s18 = smov %s1623_s19 }
 0x676   : > { %p20_p8 = scmp.ge.s32.totalorder %s23_s23, 4   ;;  %s2103_s19 = smov %s1627_s20 }
 0x677   : > { %s2104_s20 = smov %s1871_s12  ;;  %s2105_s21 = smov %s1635_s22 }
 0x678   : > { %s2106_s22 = smov %s2108_s30  ;;  %22 = sbr.rel (!%p20_p8) target bundleno = 8 (0x8), region = 124 }
 0x67f   :  { %1022 = vsyncpa [#allocation7], 1 }
 0x680   :  { %1024 = vsyncpa [#allocation7 + $0x1], 1 }
 0x681   :  { %1025 = vsyncpa [#allocation10], 1 }
 0x682   :  { %1026 = vsyncpa [#allocation13], 1 }
 0x683   :  { %1027 = vsyncpa [#allocation8], 1 }
 0x684   :  { %1029 = vsyncpa [#allocation8 + $0x1], 1 }

</bundles_post_ra>
